<compile_context>
chip_gen: v7x
topology: tpu7x:2x2x1
jax: 0.10.0
libtpu: 0.0.40
codegen_flags: <defaults>
</compile_context>

<pallas_src>
import jax
import jax.numpy as jnp
from jax.experimental import pallas as pl
from jax.experimental.pallas import tpu as pltpu

# ---- model dims / layout constants ----
F_IN = 3          # input node features
HIDDEN = 16
NCLASS = 7
LANES = 128
NEG = -1e9        # -inf-style mask for padded logit lanes

# packed parameter slab row offsets (all 8-row aligned); W1 is NOT in the slab
B1_R = 0          # conv1 bias               (1 row)
W2_R = 8          # conv2 weight             (16 rows)
W3_R = 24         # fc1[0] weight            (16 rows)
B3_R = 40         # fc1[0] bias              (1 row)
W4_R = 48         # fc1[3] weight            (16 rows, full 128 lanes, cols >= 7 zero)
B4_R = 64         # fc1[3] bias              (1 row, full 128 lanes, cols >= 7 = NEG)
CB2_R = 72        # counts[:, None] * b2     (b_pad rows)


def _round_up(v, m):
    return ((v + m - 1) // m) * m


def _tiled_bytes(rows, cols, itemsize):
    """VMEM footprint of a (rows, cols) array in TPU tiled layout:
    lanes pad to 128, sublanes pad to 8 (f32) / 16 (bf16)."""
    sub = 8 * (4 // itemsize)
    return _round_up(rows, sub) * _round_up(cols, 128) * itemsize


def _vmem_capacity_bytes():
    """Per-TensorCore VMEM capacity (64 MiB on v7x, 128 MiB on v5e/v6e)."""
    try:
        info = pltpu.get_tpu_info()
        cap = getattr(info, "vmem_capacity_bytes", None)
        if cap:
            return int(cap)
    except Exception:
        pass
    return 128 * 1024 * 1024


def _choose_tiling(n):
    """Return (tm, tk, n_pad). Small graphs: one full-extent block. Large
    graphs: generation-aware (tm, tk) tiles whose footprint is bounded
    independent of N (tm multiple of 128 so the pool@ahat lane block is legal,
    tk a multiple of 128 dividing n_pad)."""
    n8 = _round_up(max(n, 8), 8)
    if n8 <= 512:
        return n8, n8, n8
    small_vmem = _vmem_capacity_bytes() <= 64 * 1024 * 1024   # v7x-class core
    tm = 256 if small_vmem else 512
    tk_target = 1024 if small_vmem else 2048
    n_pad = _round_up(n, tm)
    tk, d = 128, 128
    while d <= min(n_pad, tk_target):
        if n_pad % d == 0:
            tk = d
        d += 128
    return tm, tk, n_pad


# ------------------------------ kernel ------------------------------

def net_kernel(xw1_ref, ahat_ref, pahat_ref, params_ref, out_ref, h1_acc, pool_acc):
    f32, bf16 = jnp.float32, jnp.bfloat16
    i = pl.program_id(0)                 # target-node (row) tile -> pooled reduction
    k = pl.program_id(1)                 # source-node (K) tile   -> h1 reduction
    ni = pl.num_programs(0)
    nk = pl.num_programs(1)
    b_pad = pool_acc.shape[0]

    @pl.when((i == 0) & (k == 0))
    def _init_pool():
        # pooled accumulator starts at counts[:, None] * b2 (conv2 bias summed per graph)
        pool_acc[...] = params_ref[CB2_R:CB2_R + b_pad, 0:HIDDEN]

    @pl.when(k == 0)
    def _init_h1():
        h1_acc[...] = jnp.zeros_like(h1_acc)

    # ---- layer-1 propagation partial sum: ahat[i, k] @ (x @ W1)[k] ----
    h1_acc[...] += jnp.dot(ahat_ref[...], xw1_ref[...], preferred_element_type=f32)

    # ---- once the K reduction for this row tile is done:
    #      bias + ReLU, then GCNConv(16,16) fused with global_add_pool:
    #      pooled += (pool @ ahat)[:, tile] @ (h1_tile @ W2)  ----
    @pl.when(k == nk - 1)
    def _row_tile_finish():
        b1 = params_ref[B1_R:B1_R + 1, 0:HIDDEN]                    # (1,16) f32
        w2 = params_ref[W2_R:W2_R + HIDDEN, 0:HIDDEN].astype(bf16)  # (16,16) bf16
        h1 = jnp.maximum(h1_acc[...] + b1, 0.0).astype(bf16)        # (tm,16)
        xw2 = jnp.dot(h1, w2, preferred_element_type=f32).astype(bf16)
        pool_acc[...] += jnp.dot(pahat_ref[...], xw2, preferred_element_type=f32)

    # ---- classifier MLP + log_softmax once the node reduction is done ----
    @pl.when((i == ni - 1) & (k == nk - 1))
    def _finish():
        w3 = params_ref[W3_R:W3_R + HIDDEN, 0:HIDDEN]
        b3 = params_ref[B3_R:B3_R + 1, 0:HIDDEN]
        w4 = params_ref[W4_R:W4_R + HIDDEN, :]       # (16,128): cols >= 7 zero
        b4 = params_ref[B4_R:B4_R + 1, :]            # (1,128):  cols >= 7 = NEG

        z = jnp.dot(pool_acc[...], w3, preferred_element_type=f32) + b3
        z = jnp.maximum(z, 0.0)
        # Dropout(0.2) is identity in eval/inference mode.
        logits = jnp.dot(z, w4, preferred_element_type=f32) + b4     # (b_pad, 128)
        m = jnp.max(logits, axis=1, keepdims=True)
        shifted = logits - m
        lse = jnp.log(jnp.sum(jnp.exp(shifted), axis=1, keepdims=True))
        out_ref[...] = shifted - lse                 # lane-dense store


# ------------------------------ wrapper ------------------------------

def pack_params(params, counts):
    """Pack weights/biases (plus counts*b2) into one (rows,128) f32 slab."""
    b_pad = counts.shape[0]
    rows = CB2_R + b_pad
    slab = jnp.zeros((rows, LANES), jnp.float32)
    slab = slab.at[B1_R, 0:HIDDEN].set(params["b1"][0])
    slab = slab.at[W2_R:W2_R + HIDDEN, 0:HIDDEN].set(params["w2"])
    slab = slab.at[W3_R:W3_R + HIDDEN, 0:HIDDEN].set(params["w3"])
    slab = slab.at[B3_R, 0:HIDDEN].set(params["b3"][0])
    slab = slab.at[W4_R:W4_R + HIDDEN, 0:NCLASS].set(params["w4"])
    slab = slab.at[B4_R, :].set(jnp.full((LANES,), NEG, jnp.float32))
    slab = slab.at[B4_R, 0:NCLASS].set(params["b4"][0])
    slab = slab.at[CB2_R:CB2_R + b_pad, 0:HIDDEN].set(counts[:, None] * params["b2"])
    return slab


def net_forward(x, ahat, pool, params):
    f32, bf16 = jnp.float32, jnp.bfloat16
    n = x.shape[0]
    b = pool.shape[0]
    tm, tk, n_pad = _choose_tiling(n)
    b_pad = _round_up(max(b, 8), 8)
    slab_rows = CB2_R + b_pad

    # Layer-1 feature transform hoisted out of the kernel ((n,3)x(3,16) GEMM, done once).
    xw1 = jnp.zeros((n_pad, HIDDEN), f32).at[:n, :].set(x @ params["w1"]).astype(bf16)

    # Padded adjacency built once, directly in bf16; pool@ahat from the same copy.
    ahat_b = jnp.zeros((n_pad, n_pad), bf16).at[:n, :n].set(ahat.astype(bf16))
    pool_pad = jnp.zeros((b_pad, n_pad), f32).at[:b, :n].set(pool)
    # Algebraic fusion glue: global_add_pool commutes with the (linear) second
    # GCN propagation, so the in-kernel N x N matmul collapses to B x N.
    pahat = jnp.dot(pool_pad.astype(bf16), ahat_b,
                    preferred_element_type=f32).astype(bf16)        # (b_pad, n_pad)
    counts = jnp.sum(pool_pad, axis=1)                              # per-graph node counts
    slab = pack_params(params, counts)

    grid = (n_pad // tm, n_pad // tk)

    # Generation-aware scoped-VMEM sizing; accounts for tiled (sublane, 128-lane) layout.
    vmem_est = (
        2 * _tiled_bytes(tm, tk, 2)               # ahat tile (bf16, double-buffered)
        + 2 * _tiled_bytes(tk, HIDDEN, 2)         # xw1 tile
        + 2 * _tiled_bytes(b_pad, tm, 2)          # pool@ahat tile
        + 2 * _tiled_bytes(slab_rows, LANES, 4)   # packed params
        + 2 * _tiled_bytes(b_pad, LANES, 4)       # output block
        + _tiled_bytes(tm, HIDDEN, 4)             # h1 accumulator scratch
        + _tiled_bytes(b_pad, HIDDEN, 4)          # pooled accumulator scratch
        + 4 * _tiled_bytes(tm, LANES, 4)          # in-kernel lane-padded temporaries
        + (2 << 20)                               # headroom
    )
    cap = _vmem_capacity_bytes()
    cp = dict(dimension_semantics=("arbitrary", "arbitrary"))   # both axes are reductions
    default_scoped = 16 * 1024 * 1024             # v5e's default scoped-VMEM limit
    if vmem_est > default_scoped:
        cp["vmem_limit_bytes"] = min(int(vmem_est), (cap * 3) // 4)

    out = pl.pallas_call(
        net_kernel,
        out_shape=jax.ShapeDtypeStruct((b_pad, LANES), f32),
        grid_spec=pltpu.PrefetchScalarGridSpec(
            num_scalar_prefetch=0,
            grid=grid,
            in_specs=[
                pl.BlockSpec((tk, HIDDEN), lambda i, k: (k, 0)),       # x@W1 (bf16)
                pl.BlockSpec((tm, tk), lambda i, k: (i, k)),           # ahat tile (bf16)
                pl.BlockSpec((b_pad, tm), lambda i, k: (0, i)),        # pool@ahat col tile (bf16)
                pl.BlockSpec((slab_rows, LANES), lambda i, k: (0, 0)), # packed params (f32)
            ],
            out_specs=pl.BlockSpec((b_pad, LANES), lambda i, k: (0, 0)),
            scratch_shapes=[pltpu.VMEM((tm, HIDDEN), f32),
                            pltpu.VMEM((b_pad, HIDDEN), f32)],
        ),
        compiler_params=pltpu.CompilerParams(**cp),
    )(xw1, ahat_b, pahat, slab)
    return out[:b, :NCLASS]


# ------------------------- plain-JAX glue -------------------------

def build_gcn_norm_adj(edge_index, num_nodes):
    """Dense D^-1/2 (A + I) D^-1/2 matching PyG GCNConv gcn_norm
    (source->target flow, unit edge weights, add_self_loops=True)."""
    src = edge_index[0]
    dst = edge_index[1]
    adj = jnp.zeros((num_nodes, num_nodes), jnp.float32)
    adj = adj.at[src, dst].add(1.0)
    adj = adj + jnp.eye(num_nodes, dtype=jnp.float32)
    deg = jnp.sum(adj, axis=0)
    dinv = jnp.where(deg > 0, 1.0 / jnp.sqrt(deg), 0.0)
    return dinv[:, None] * adj.T * dinv[None, :]


def build_pool_matrix(batch, num_graphs):
    return (batch[None, :] == jnp.arange(num_graphs)[:, None]).astype(jnp.float32)


def init_params(key):
    ks = jax.random.split(key, 8)

    def glorot(k, fan_in, fan_out):
        scale = jnp.sqrt(6.0 / (fan_in + fan_out))
        return jax.random.uniform(k, (fan_in, fan_out), jnp.float32, -scale, scale)

    return {
        "w1": glorot(ks[0], F_IN, HIDDEN),
        "b1": jax.random.normal(ks[1], (1, HIDDEN), jnp.float32) * 0.01,
        "w2": glorot(ks[2], HIDDEN, HIDDEN),
        "b2": jax.random.normal(ks[3], (1, HIDDEN), jnp.float32) * 0.01,
        "w3": glorot(ks[4], HIDDEN, HIDDEN),
        "b3": jax.random.normal(ks[5], (1, HIDDEN), jnp.float32) * 0.01,
        "w4": glorot(ks[6], HIDDEN, NCLASS),
        "b4": jax.random.normal(ks[7], (1, NCLASS), jnp.float32) * 0.01,
    }


def net_reference(x, ahat, pool, params):
    h1 = jnp.maximum(ahat @ (x @ params["w1"]) + params["b1"], 0.0)
    h2 = ahat @ (h1 @ params["w2"]) + params["b2"]
    pooled = pool @ h2
    z = jnp.maximum(pooled @ params["w3"] + params["b3"], 0.0)
    logits = z @ params["w4"] + params["b4"]
    return jax.nn.log_softmax(logits, axis=1)


if __name__ == "__main__":
    key = jax.random.PRNGKey(0)
    k_x, k_p = jax.random.split(key)

    # Two graphs of 8 nodes each (16 nodes total), 3 input features.
    N, B = 16, 2
    x = jax.random.normal(k_x, (N, F_IN), jnp.float32)

    # Bidirectional ring inside each 8-node component.
    edges = []
    for g in range(B):
        base = g * 8
        for i in range(8):
            s, t = base + i, base + (i + 1) % 8
            edges.append((s, t))
            edges.append((t, s))
    edge_index = jnp.array(edges, dtype=jnp.int32).T           # (2, 32)
    batch = jnp.repeat(jnp.arange(B, dtype=jnp.int32), 8)      # (16,)

    ahat = build_gcn_norm_adj(edge_index, N)                   # (16, 16)
    pool = build_pool_matrix(batch, B)                         # (2, 16)
    params = init_params(k_p)

    out = net_forward(x, ahat, pool, params)                   # (2, 7) log-probs
    out = jax.block_until_ready(out)

    assert out.shape == (B, NCLASS)
    assert jnp.allclose(jnp.sum(jnp.exp(out), axis=1), 1.0, atol=1e-3)
    ref = net_reference(x, ahat, pool, params)
    assert jnp.allclose(out, ref, atol=5e-2, rtol=2e-2)        # bf16-propagation tolerance
    print("KERNEL_OK")
</pallas_src>

<mosaic_0001>
module attributes {stable_mosaic.version = 11 : i64} {
  func.func @net_kernel(%arg0: i32, %arg1: i32, %arg2: memref<16x16xbf16, #tpu.memory_space<vmem>>, %arg3: memref<16x16xbf16, #tpu.memory_space<vmem>>, %arg4: memref<8x16xbf16, #tpu.memory_space<vmem>>, %arg5: memref<80x128xf32, #tpu.memory_space<vmem>>, %arg6: memref<8x128xf32, #tpu.memory_space<vmem>>, %arg7: memref<16x16xf32, #tpu.memory_space<vmem>>, %arg8: memref<8x16xf32, #tpu.memory_space<vmem>>) attributes {dimension_semantics = [#tpu.dimension_semantics<arbitrary>, #tpu.dimension_semantics<arbitrary>], iteration_bounds = array<i64: 1, 1>, scalar_prefetch = 0 : i64, scratch_operands = 2 : i64, tpu.core_type = #tpu.core_type<tc>, window_params = [{transform_indices = @transform_0, window_bounds = array<i64: 16, 16>}, {transform_indices = @transform_1, window_bounds = array<i64: 16, 16>}, {transform_indices = @transform_2, window_bounds = array<i64: 8, 16>}, {pipeline_mode = #tpu.pipeline_mode<synchronous>, transform_indices = @transform_3, window_bounds = array<i64: 80, 128>}, {pipeline_mode = #tpu.pipeline_mode<synchronous>, transform_indices = @transform_4, window_bounds = array<i64: 8, 128>}]} {
    %c0_i32 = arith.constant 0 : i32
    %0 = arith.cmpi eq, %arg0, %c0_i32 : i32
    %c0_i32_0 = arith.constant 0 : i32
    %1 = arith.cmpi eq, %arg1, %c0_i32_0 : i32
    %2 = arith.andi %0, %1 : i1
    %3 = arith.extui %2 : i1 to i32
    %c0_i32_1 = arith.constant 0 : i32
    %4 = arith.cmpi ne, %3, %c0_i32_1 : i32
    scf.if %4 {
      %c72 = arith.constant 72 : index
      %c0_16 = arith.constant 0 : index
      %22 = vector.load %arg5[%c72, %c0_16] : memref<80x128xf32, #tpu.memory_space<vmem>>, vector<8x16xf32>
      %c0_17 = arith.constant 0 : index
      %c0_18 = arith.constant 0 : index
      %23 = vector.load %arg8[%c0_17, %c0_18] : memref<8x16xf32, #tpu.memory_space<vmem>>, vector<8x16xf32>
      tpu.vector_store %arg8[%c0_17, %c0_18], %22 {strides = array<i32>} : memref<8x16xf32, #tpu.memory_space<vmem>>, vector<8x16xf32>,
    } else {
    }
    %c0_i32_2 = arith.constant 0 : i32
    %5 = arith.cmpi eq, %arg1, %c0_i32_2 : i32
    %6 = arith.extui %5 : i1 to i32
    %c0_i32_3 = arith.constant 0 : i32
    %7 = arith.cmpi ne, %6, %c0_i32_3 : i32
    scf.if %7 {
      %cst_16 = arith.constant 0.000000e+00 : f32
      %22 = vector.broadcast %cst_16 : f32 to vector<16x16xf32>
      %c0_17 = arith.constant 0 : index
      %c0_18 = arith.constant 0 : index
      %23 = vector.load %arg7[%c0_17, %c0_18] : memref<16x16xf32, #tpu.memory_space<vmem>>, vector<16x16xf32>
      tpu.vector_store %arg7[%c0_17, %c0_18], %22 {strides = array<i32>} : memref<16x16xf32, #tpu.memory_space<vmem>>, vector<16x16xf32>,
    } else {
    }
    %c0 = arith.constant 0 : index
    %c0_4 = arith.constant 0 : index
    %8 = vector.load %arg7[%c0, %c0_4] : memref<16x16xf32, #tpu.memory_space<vmem>>, vector<16x16xf32>
    %c0_5 = arith.constant 0 : index
    %c0_6 = arith.constant 0 : index
    %9 = vector.load %arg3[%c0_5, %c0_6] : memref<16x16xbf16, #tpu.memory_space<vmem>>, vector<16x16xbf16>
    %c0_7 = arith.constant 0 : index
    %c0_8 = arith.constant 0 : index
    %10 = vector.load %arg2[%c0_7, %c0_8] : memref<16x16xbf16, #tpu.memory_space<vmem>>, vector<16x16xbf16>
    %cst = arith.constant dense<0.000000e+00> : vector<16x16xf32>
    %11 = tpu.matmul %9, %10, %cst {dimension_numbers = #tpu.dot_dimension_numbers<[1], [0], [0], [1], [0, 0, 1, 1], [], []>} : vector<16x16xbf16>, vector<16x16xbf16>, vector<16x16xf32> -> vector<16x16xf32>
    %12 = arith.addf %8, %11 : vector<16x16xf32>
    %c0_9 = arith.constant 0 : index
    %c0_10 = arith.constant 0 : index
    %13 = vector.load %arg7[%c0_9, %c0_10] : memref<16x16xf32, #tpu.memory_space<vmem>>, vector<16x16xf32>
    tpu.vector_store %arg7[%c0_9, %c0_10], %12 {strides = array<i32>} : memref<16x16xf32, #tpu.memory_space<vmem>>, vector<16x16xf32>,
    %c0_i32_11 = arith.constant 0 : i32
    %14 = arith.cmpi eq, %arg1, %c0_i32_11 : i32
    %15 = arith.extui %14 : i1 to i32
    %c0_i32_12 = arith.constant 0 : i32
    %16 = arith.cmpi ne, %15, %c0_i32_12 : i32
    scf.if %16 {
      %c0_16 = arith.constant 0 : index
      %c0_17 = arith.constant 0 : index
      %22 = vector.load %arg5[%c0_16, %c0_17] : memref<80x128xf32, #tpu.memory_space<vmem>>, vector<1x16xf32>
      %c8 = arith.constant 8 : index
      %c0_18 = arith.constant 0 : index
      %23 = vector.load %arg5[%c8, %c0_18] : memref<80x128xf32, #tpu.memory_space<vmem>>, vector<16x16xf32>
      %24 = arith.truncf %23 : vector<16x16xf32> to vector<16x16xbf16>
      %c0_19 = arith.constant 0 : index
      %c0_20 = arith.constant 0 : index
      %25 = vector.load %arg7[%c0_19, %c0_20] : memref<16x16xf32, #tpu.memory_space<vmem>>, vector<16x16xf32>
      %26 = vector.broadcast %22 : vector<1x16xf32> to vector<16x16xf32>
      %27 = arith.addf %25, %26 : vector<16x16xf32>
      %cst_21 = arith.constant 0.000000e+00 : f32
      %28 = vector.broadcast %cst_21 : f32 to vector<16x16xf32>
      %29 = arith.maximumf %27, %28 : vector<16x16xf32>
      %30 = arith.truncf %29 : vector<16x16xf32> to vector<16x16xbf16>
      %cst_22 = arith.constant dense<0.000000e+00> : vector<16x16xf32>
      %31 = tpu.matmul %30, %24, %cst_22 {dimension_numbers = #tpu.dot_dimension_numbers<[1], [0], [0], [1], [0, 0, 1, 1], [], []>} : vector<16x16xbf16>, vector<16x16xbf16>, vector<16x16xf32> -> vector<16x16xf32>
      %32 = arith.truncf %31 : vector<16x16xf32> to vector<16x16xbf16>
      %c0_23 = arith.constant 0 : index
      %c0_24 = arith.constant 0 : index
      %33 = vector.load %arg8[%c0_23, %c0_24] : memref<8x16xf32, #tpu.memory_space<vmem>>, vector<8x16xf32>
      %c0_25 = arith.constant 0 : index
      %c0_26 = arith.constant 0 : index
      %34 = vector.load %arg4[%c0_25, %c0_26] : memref<8x16xbf16, #tpu.memory_space<vmem>>, vector<8x16xbf16>
      %cst_27 = arith.constant dense<0.000000e+00> : vector<8x16xf32>
      %35 = tpu.matmul %34, %32, %cst_27 {dimension_numbers = #tpu.dot_dimension_numbers<[1], [0], [0], [1], [0, 0, 1, 1], [], []>} : vector<8x16xbf16>, vector<16x16xbf16>, vector<8x16xf32> -> vector<8x16xf32>
      %36 = arith.addf %33, %35 : vector<8x16xf32>
      %c0_28 = arith.constant 0 : index
      %c0_29 = arith.constant 0 : index
      %37 = vector.load %arg8[%c0_28, %c0_29] : memref<8x16xf32, #tpu.memory_space<vmem>>, vector<8x16xf32>
      tpu.vector_store %arg8[%c0_28, %c0_29], %36 {strides = array<i32>} : memref<8x16xf32, #tpu.memory_space<vmem>>, vector<8x16xf32>,
    } else {
    }
    %c0_i32_13 = arith.constant 0 : i32
    %17 = arith.cmpi eq, %arg0, %c0_i32_13 : i32
    %c0_i32_14 = arith.constant 0 : i32
    %18 = arith.cmpi eq, %arg1, %c0_i32_14 : i32
    %19 = arith.andi %17, %18 : i1
    %20 = arith.extui %19 : i1 to i32
    %c0_i32_15 = arith.constant 0 : i32
    %21 = arith.cmpi ne, %20, %c0_i32_15 : i32
    scf.if %21 {
      %c24 = arith.constant 24 : index
      %c0_16 = arith.constant 0 : index
      %22 = vector.load %arg5[%c24, %c0_16] : memref<80x128xf32, #tpu.memory_space<vmem>>, vector<16x16xf32>
      %c40 = arith.constant 40 : index
      %c0_17 = arith.constant 0 : index
      %23 = vector.load %arg5[%c40, %c0_17] : memref<80x128xf32, #tpu.memory_space<vmem>>, vector<1x16xf32>
      %c48 = arith.constant 48 : index
      %c0_18 = arith.constant 0 : index
      %24 = vector.load %arg5[%c48, %c0_18] : memref<80x128xf32, #tpu.memory_space<vmem>>, vector<16x128xf32>
      %c64 = arith.constant 64 : index
      %c0_19 = arith.constant 0 : index
      %25 = vector.load %arg5[%c64, %c0_19] : memref<80x128xf32, #tpu.memory_space<vmem>>, vector<1x128xf32>
      %c0_20 = arith.constant 0 : index
      %c0_21 = arith.constant 0 : index
      %26 = vector.load %arg8[%c0_20, %c0_21] : memref<8x16xf32, #tpu.memory_space<vmem>>, vector<8x16xf32>
      %cst_22 = arith.constant dense<0.000000e+00> : vector<8x16xf32>
      %27 = tpu.matmul %26, %22, %cst_22 {dimension_numbers = #tpu.dot_dimension_numbers<[1], [0], [0], [1], [0, 0, 1, 1], [], []>} : vector<8x16xf32>, vector<16x16xf32>, vector<8x16xf32> -> vector<8x16xf32>
      %28 = vector.broadcast %23 : vector<1x16xf32> to vector<8x16xf32>
      %29 = arith.addf %27, %28 : vector<8x16xf32>
      %cst_23 = arith.constant 0.000000e+00 : f32
      %30 = vector.broadcast %cst_23 : f32 to vector<8x16xf32>
      %31 = arith.maximumf %29, %30 : vector<8x16xf32>
      %cst_24 = arith.constant dense<0.000000e+00> : vector<8x128xf32>
      %32 = tpu.matmul %31, %24, %cst_24 {dimension_numbers = #tpu.dot_dimension_numbers<[1], [0], [0], [1], [0, 0, 1, 1], [], []>} : vector<8x16xf32>, vector<16x128xf32>, vector<8x128xf32> -> vector<8x128xf32>
      %33 = vector.broadcast %25 : vector<1x128xf32> to vector<8x128xf32>
      %34 = arith.addf %32, %33 : vector<8x128xf32>
      %cst_25 = arith.constant dense<0xFF800000> : vector<8xf32>
      %35 = vector.multi_reduction <maximumf>, %34, %cst_25 [1] : vector<8x128xf32> to vector<8xf32>
      %36 = vector.shape_cast %35 : vector<8xf32> to vector<8x1xf32>
      %37 = vector.broadcast %36 : vector<8x1xf32> to vector<8x128xf32>
      %38 = arith.subf %34, %37 : vector<8x128xf32>
      %39 = math.exp %38 : vector<8x128xf32>
      %cst_26 = arith.constant dense<0.000000e+00> : vector<8xf32>
      %40 = vector.multi_reduction <add>, %39, %cst_26 [1] : vector<8x128xf32> to vector<8xf32>
      %41 = vector.shape_cast %40 : vector<8xf32> to vector<8x1xf32>
      %42 = math.log %41 : vector<8x1xf32>
      %43 = vector.broadcast %42 : vector<8x1xf32> to vector<8x128xf32>
      %44 = arith.subf %38, %43 : vector<8x128xf32>
      %c0_27 = arith.constant 0 : index
      %c0_28 = arith.constant 0 : index
      %45 = vector.load %arg6[%c0_27, %c0_28] : memref<8x128xf32, #tpu.memory_space<vmem>>, vector<8x128xf32>
      tpu.vector_store %arg6[%c0_27, %c0_28], %44 {strides = array<i32>} : memref<8x128xf32, #tpu.memory_space<vmem>>, vector<8x128xf32>,
    } else {
    }
    return
  }
  func.func @transform_0(%arg0: i32, %arg1: i32) -> (i32, i32) {
    %c0_i32 = arith.constant 0 : i32
    %c0_i32_0 = arith.constant 0 : i32
    return %arg1, %c0_i32 : i32, i32
  }
  func.func @transform_1(%arg0: i32, %arg1: i32) -> (i32, i32) {
    %c0_i32 = arith.constant 0 : i32
    return %arg0, %arg1 : i32, i32
  }
  func.func @transform_2(%arg0: i32, %arg1: i32) -> (i32, i32) {
    %c0_i32 = arith.constant 0 : i32
    %c0_i32_0 = arith.constant 0 : i32
    return %c0_i32, %arg0 : i32, i32
  }
  func.func @transform_3(%arg0: i32, %arg1: i32) -> (i32, i32) {
    %c0_i32 = arith.constant 0 : i32
    %c0_i32_0 = arith.constant 0 : i32
    %c0_i32_1 = arith.constant 0 : i32
    return %c0_i32, %c0_i32_0 : i32, i32
  }
  func.func @transform_4(%arg0: i32, %arg1: i32) -> (i32, i32) {
    %c0_i32 = arith.constant 0 : i32
    %c0_i32_0 = arith.constant 0 : i32
    %c0_i32_1 = arith.constant 0 : i32
    return %c0_i32, %c0_i32_0 : i32, i32
  }
}

</mosaic_0001>

<bundles_post_ra>
// kernel: tpu_custom_call.1
= control target key start
LH: loop header
LB: loop body
LE: loop exit
PB: predicated region body
PF: predicated region fallthrough
CT: control target
= control target key end

     0   :  { %9 = vsyncpa [#allocation5], 0  ;;  %s733_s0 = inlined_call_operand.hbm [shape: bf16[16,16], index: 0, kind: input, shape index: {}]   ;;  %s734_s1 = inlined_call_operand.hbm [shape: bf16[16,16], index: 1, kind: input, shape index: {}]   ;;  %s735_s2 = inlined_call_operand.vmem [shape: bf16[8,16], index: 2, kind: input, shape index: {}]   ;;  %s736_s3 = inlined_call_operand.hbm [shape: f32[80,128], index: 3, kind: input, shape index: {}]   ;;  %s737_s4 = inlined_call_operand.hbm [shape: f32[8,128], index: 4, kind: output, shape index: {}]  }
   0x1   :  { %10 = vsyncpa [#allocation8], 0 }
   0x2   :  { %11 = vsyncpa [#allocation6], 0  ;;  %s613_s15 = smov [#allocation7]   ;;  %s614_s17 = smov [#allocation4]  }
   0x3   :  { %s29_s16 = sshll.u32 %s613_s15, 4  ;;  %s17_s18 = sshll.u32 %s614_s17, 4  ;;  %s30_s16 = int_to_ptr.vmem [resolvable:$true] %s29_s16  ;;  %s649_s18 = int_to_ptr.vmem [resolvable:$true] %s17_s18 }
   0x4   :  { %s519_s21 = scalar_lea.hbm %s734_s1, 128 }
   0x5   :  { %p520_p0 = scmp.ne.s32.totalorder %s734_s1, %s519_s21  ;;  %p523_p1 = scmp.lt.u32.totalorder %s519_s21, %s734_s1 }
   0x7   :  { %p525_p2 = pnand %p523_p1, %p520_p0 }
   0x9   :  { %528 = shalt.err (!%p525_p2)
}
   0xa   :  { %s529_s26 = scalar_lea.vmem %s30_s16, 128  ;;  %p534_p4 = scmp.lt.s32.totalorder %s30_s16, %s30_s16 }
   0xb   :  { %p530_p3 = scmp.ne.s32.totalorder %s30_s16, %s529_s26  ;;  %p535_p5 = scmp.lt.s32.totalorder %s529_s26, %s529_s26 }
   0xd   :  { %p536_p6 = por %p535_p5, %p534_p4 }
   0xf   :  { %p537_p7 = pnand %p536_p6, %p530_p3 }
  0x11   :  { %540 = shalt.err (!%p537_p7)
}
  0x12   :  { %s615_s27 = smov 64   ;;  %s616_s28 = smov 4  }
  0x13   :  { %35 = dma.hbm_to_vmem [thread:$0]  %s734_s1, 128, %s30_s16, [#allocation8], %s615_s27, %s615_s27, %s616_s28  }
  0x14   :  { %s541_s7 = scalar_lea.hbm %s733_s0, 128 }
  0x15   :  { %p542_p8 = scmp.ne.s32.totalorder %s733_s0, %s541_s7  ;;  %p545_p9 = scmp.lt.u32.totalorder %s541_s7, %s733_s0 }
  0x17   :  { %p547_p10 = pnand %p545_p9, %p542_p8 }
  0x19   :  { %550 = shalt.err (!%p547_p10)
}
  0x1a   :  { %s551_s12 = scalar_lea.vmem %s649_s18, 128  ;;  %p556_p12 = scmp.lt.s32.totalorder %s649_s18, %s649_s18 }
  0x1b   :  { %p552_p11 = scmp.ne.s32.totalorder %s649_s18, %s551_s12  ;;  %p557_p13 = scmp.lt.s32.totalorder %s551_s12, %s551_s12 }
  0x1d   :  { %p558_p0 = por %p557_p13, %p556_p12 }
  0x1f   :  { %p559_p1 = pnand %p558_p0, %p552_p11 }
  0x21   :  { %562 = shalt.err (!%p559_p1)
}
  0x22   :  { %23 = dma.hbm_to_vmem [thread:$0]  %s733_s0, 128, %s649_s18, [#allocation5], %s615_s27, %s615_s27, %s616_s28  }
  0x23   :  { %s617_s14 = smov [#allocation9]   ;;  %s563_s19 = scalar_lea.hbm %s736_s3, 1280 }
  0x24   :  { %s43_s15 = sshll.u32 %s617_s14, 4  ;;  %p564_p2 = scmp.ne.s32.totalorder %s736_s3, %s563_s19  ;;  %s44_s15 = int_to_ptr.vmem [resolvable:$true] %s43_s15 }
  0x25   :  { %p567_p3 = scmp.lt.u32.totalorder %s563_s19, %s736_s3 }
  0x27   :  { %p569_p4 = pnand %p567_p3, %p564_p2 }
  0x29   :  { %572 = shalt.err (!%p569_p4)
}
  0x2a   :  { %s573_s24 = scalar_lea.vmem %s44_s15, 1280  ;;  %p578_p6 = scmp.lt.s32.totalorder %s44_s15, %s44_s15 }
  0x2b   :  { %p574_p5 = scmp.ne.s32.totalorder %s44_s15, %s573_s24  ;;  %p579_p7 = scmp.lt.s32.totalorder %s573_s24, %s573_s24 }
  0x2d   :  { %p580_p8 = por %p579_p7, %p578_p6 }
  0x2f   :  { %p581_p9 = pnand %p580_p8, %p574_p5 }
  0x31   :  { %584 = shalt.err (!%p581_p9)
}
  0x32   :  { %s618_s0 = smov 128   ;;  %s619_s18 = smov 8  }
  0x33   :  { %49 = dma.hbm_to_vmem [thread:$0]  %s736_s3, 1280, %s44_s15, [#allocation8], %s618_s0, %s618_s0, %s619_s18  }
  0x34   :  { %607 = dma.done.wait [#allocation5], 128  }
  0x35   :  { %608 = vsyncadd [#allocation5], 4294967168 }
  0x36   :  { %609 = dma.done.wait [#allocation8], 1408  }
  0x37   :  { %610 = vsyncadd [#allocation8], 4294965888  ;;  %vm67_vm0 = vcmask 130048   ;;  %v620_v0 = vmov 0.0   ;;  %vm621_vm1 = vmmov 0   ;;  %v513_v1 = vld [vmem:[#allocation4] sm:$0xff]  }
  0x38   :  { %464 = vmatprep.subr.bf16.mxu0 %v620_v0  ;;  %466 = vmatprep.mubr.msk.bf16.mxu0 %vm621_vm1, %v620_v0  ;;  %73 = vst.msk [vmem:[#allocation2] sm:$0xff] %vm67_vm0, %v620_v0  ;;  %74 = vst.msk [vmem:[#allocation2 + $0x8] sm:$0xff] %vm67_vm0, %v620_v0  ;;  %v514_v2 = vld [vmem:[#allocation7] sm:$0xff]   ;;  %v145_v3 = vld [vmem:[#allocation9 + $0x8] sm:$0xff]  ;;  %v622_v31 = vmov 0.0|0.0  }
  0x39   :  { %470 = vmatprep.subr.bf16.mxu1 %v620_v0  ;;  %472 = vmatprep.mubr.msk.bf16.mxu1 %vm621_vm1, %v620_v0  ;;  %v146_v4 = vld [vmem:[#allocation9 + $0x10] sm:$0xff]  ;;  %v445_v14 = vld [vmem:[#allocation9] ss:$0 sm:$0xff]  ;;  %v66_v22 = vld [vmem:[#allocation9 + $0x48] sm:$0xff] }
  0x3a   :  { %465 = vmatpush3.bf16.msra.mxu0 %v513_v1  ;;  %v147_v5 = vpack.c.bf16 %v146_v4, %v145_v3  ;;  %68 = vst.msk [vmem:[#allocation3] sm:$0xff] %vm67_vm0, %v66_v22  ;;  %v205_v28 = vld [vmem:[%s735_s2] sm:$0xf]  ;;  %v254_v30 = vld [vmem:[#allocation9 + $0x20] sm:$0xff]  ;;  %v256_v40 = vld [vmem:[#allocation9 + $0x30] sm:$0xff]  ;;  %s623_s2 = smov [#allocation10]  }
  0x3b   :  { %476 = vmatprep.subr.bf16.mxu0 %v620_v0  ;;  %v253_v29 = vld [vmem:[#allocation9 + $0x18] sm:$0xff]  ;;  %v448_v43 = vld [vmem:[#allocation9 + $0x28] ss:$0 sm:$0xff]  ;;  %v450_v48 = vld [vmem:[#allocation9 + $0x40] ss:$0 sm:$0xff]  ;;  %s432_s28 = sshll.u32 %s623_s2, 4  ;;  %s433_s28 = int_to_ptr.vmem [resolvable:$true] %s432_s28 }
  0x3c   :  { %471 = vmatpush3.bf16.msra.mxu1 %v147_v5  ;;  %v497_v32 = vpack.c.bf16 %v254_v30, %v253_v29  ;;  %v257_v41 = vld [vmem:[#allocation9 + $0x38] sm:$0xff]  ;;  %s585_s29 = scalar_lea.vmem %s433_s28, 128  ;;  %p590_p11 = scmp.lt.s32.totalorder %s433_s28, %s433_s28 }
  0x3d   :  { %467 = vmatmul.mubr.msk.bf16.vlgmr.msra.gmra.mrb[0].mxu0 %vm67_vm0, %v514_v2  ;;  %496 = vmatprep.subr.bf16.mxu1 %v622_v31  ;;  %v500_v42 = vpack.c.bf16 %v257_v41, %v256_v40  ;;  %p586_p10 = scmp.ne.s32.totalorder %s433_s28, %s585_s29  ;;  %p591_p12 = scmp.lt.s32.totalorder %s585_s29, %s585_s29 }
  0x3e   :  { %478 = vmatprep.mubr.msk.bf16.mxu0 %vm621_vm1, %v620_v0 }
  0x3f   :  { %v75_v6 = vld [vmem:[#allocation2] sm:$0xff]  ;;  %v76_v8 = vld [vmem:[#allocation2 + $0x8] sm:$0xff]  ;;  %p592_p13 = por %p591_p12, %p590_p11 }
  0x41   :  { %v204_v33 = vld [vmem:[#allocation3] sm:$0xff]  ;;  %p593_p0 = pnand %p592_p13, %p586_p10 }
 0x110   :  { %v130_v7 = vpop.f32.mrb[0].mxu0 }
 0x111   :  { %v137_v9 = vadd.f32 %v130_v7, %v75_v6  ;;  %v468_v10 = vpop.f32.mrb[1].mxu0 }
 0x112   :  { %v133_v11 = vpop.f32.mrb[2].mxu0 }
 0x113   :  { %139 = vst.msk [vmem:[#allocation2] sm:$0xff] %vm67_vm0, %v137_v9  ;;  %v138_v12 = vadd.f32 %v133_v11, %v76_v8  ;;  %v469_v13 = vpop.f32.mrb[3].mxu0 }
 0x115   :  { %140 = vst.msk [vmem:[#allocation2 + $0x8] sm:$0xff] %vm67_vm0, %v138_v12 }
 0x11a   :  { %v148_v15 = vld [vmem:[#allocation2] sm:$0xff] }
 0x11b   :  { %v154_v16 = vadd.f32 %v445_v14, %v148_v15 }
 0x11c   :  { %v149_v17 = vld [vmem:[#allocation2 + $0x8] sm:$0xff] }
 0x11d   :  { %v155_v18 = vadd.f32 %v445_v14, %v149_v17  ;;  %v156_v19 = vmax.f32 %v154_v16, 0.0 }
 0x11f   :  { %v157_v20 = vmax.f32 %v155_v18, 0.0 }
 0x121   :  { %v158_v21 = vpack.c.bf16 %v157_v20, %v156_v19 }
 0x123   :  { %473 = vmatmul.mubr.msk.bf16.vlgmr.msra.gmra.mrb[0].mxu1 %vm67_vm0, %v158_v21 }
 0x124   :  { %486 = vmatprep.mubr.msk.f32.mxu1 %vm621_vm1, %v620_v0  ;;  %498 = vmatpush3.bf16.msra.mxu1 %v497_v32 }
 0x125   :  { %499 = vmatprep.subr.bf16.mxu1 %v622_v31 }
 0x1f6   :  { %v196_v23 = vpop.f32.mrb[0].mxu1 }
 0x1f7   :  { %v474_v24 = vpop.f32.mrb[1].mxu1 }
 0x1f8   :  { %v199_v25 = vpop.f32.mrb[2].mxu1 }
 0x1f9   :  { %v203_v26 = vpack.c.bf16 %v199_v25, %v196_v23  ;;  %v475_v27 = vpop.f32.mrb[3].mxu1 }
 0x1fb   :  { %477 = vmatpush3.bf16.msra.mxu0 %v203_v26 }
 0x1fe   :  { %479 = vmatmul.mubr.msk.bf16.vlgmr.msra.gmra.mrb[4].mxu0 %vm67_vm0, %v205_v28 }
 0x2d1   :  { %v243_v34 = vpop.f32.mrb[4].mxu0 }
 0x2d2   :  { %v249_v35 = vadd.f32 %v243_v34, %v204_v33  ;;  %v480_v36 = vpop.f32.mrb[5].mxu0 }
 0x2d3   :  { %v246_v37 = vpop.f32.mrb[6].mxu0 }
 0x2d4   :  { %250 = vst.msk [vmem:[#allocation3] sm:$0xff] %vm67_vm0, %v249_v35  ;;  %v481_v38 = vpop.f32.mrb[7].mxu0 }
 0x2db   :  { %v259_v39 = vld [vmem:[#allocation3] sm:$0xff] }
 0x2dc   :  { %487 = vmatmul.mubr.msk.f32.vlgmr.msra.gmra.mrb[4].mxu1 %vm67_vm0, %v259_v39 }
 0x2dd   :  { %493 = vmatprep.mubr.msk.f32.mxu1 %vm621_vm1, %v620_v0  ;;  %501 = vmatpush3.bf16.msra.mxu1 %v500_v42 }
 0x3af   :  { %v333_v44 = vpop.f32.mrb[4].mxu1 }
 0x3b0   :  { %v334_v45 = vadd.f32 %v448_v43, %v333_v44  ;;  %v488_v46 = vpop.f32.mrb[5].mxu1 }
 0x3b2   :  { %v337_v47 = vmax.f32 %v334_v45, 0.0 }
 0x3b4   :  { %494 = vmatmul.mubr.msk.f32.vlgmr.msra.gmra.mrb[6].mxu1 %vm67_vm0, %v337_v47 }
 0x487   :  { %v411_v49 = vpop.f32.mrb[6].mxu1 }
 0x488   :  { %v412_v50 = vadd.f32 %v450_v48, %v411_v49  ;;  %v495_v51 = vpop.f32.mrb[7].mxu1 }
 0x48a   :  { %415 = vmax.xlane.f32.xlu0 %v412_v50 }
 0x517   :  { %v416_v52 = vpop.xlane.xlu0 %415 }
 0x518   :  { %v417_v53 = vsub.f32 %v412_v50, %v416_v52 }
 0x51a   :  { %v418_v54 = vmul.f32 1.442695, %v417_v53 }
 0x51c   :  { %515 = vpow2.f32 %v418_v54 }
 0x526   :  { %v516_v55 = vpop.eup %515 }
 0x527   :  { %420 = vadd.xlane.f32.xlu0 %v516_v55 }
 0x5b4   :  { %v421_v56 = vpop.xlane.xlu0 %420 }
 0x5b5   :  { %517 = vlog2.f32 %v421_v56 }
 0x5bf   :  { %v518_v57 = vpop.eup %517 }
 0x5c0   :  { %v423_v58 = vmul.f32 0.6931472, %v518_v57 }
 0x5c2   :  { %v424_v59 = vsub.f32 %v417_v53, %v423_v58 }
 0x5c4   :  { %425 = vst [vmem:[#allocation10] sm:$0xff] %v424_v59 }
 0x5c5   :  { %596 = shalt.err (!%p593_p0)
}
 0x5c6   :  { %s597_s6 = scalar_lea.hbm %s737_s4, 128 }
 0x5c7   :  { %p598_p1 = scmp.ne.s32.totalorder %s737_s4, %s597_s6  ;;  %p601_p2 = scmp.lt.u32.totalorder %s597_s6, %s737_s4 }
 0x5c9   :  { %p603_p3 = pnand %p601_p2, %p598_p1 }
 0x5cb   :  { %606 = shalt.err (!%p603_p3)
}
 0x5cc   :  { %435 = dma.vmem_to_hbm [thread:$0]  %s433_s28, 128, %s737_s4, [#allocation6]  }
 0x5cd   :  { %611 = dma.done.wait [#allocation6], 128  }
 0x5ce   :  { %612 = vsyncadd [#allocation6], 4294967168 }
 0x5cf   :  { %439 = vsyncpa [#allocation5], 1 }
 0x5d0   :  { %440 = vsyncpa [#allocation8], 1 }
 0x5d1   :  { %441 = vsyncpa [#allocation6], 1 }

</bundles_post_ra>
